<compile_context>
chip_gen: v7x
topology: tpu7x:2x2x1
jax: 0.10.0
libtpu: 0.0.40
codegen_flags: <defaults>
</compile_context>

<pallas_src>
import functools

import jax
import jax.numpy as jnp
from jax import lax
from jax.experimental import pallas as pl
from jax.experimental.pallas import tpu as pltpu


def _round_up(x, m):
    return ((x + m - 1) // m) * m


def _cdiv(a, b):
    return (a + b - 1) // b


# ----------------------------------------------------------------------------
# Kernels
# ----------------------------------------------------------------------------

def _biv_kernel_lane(yp_ref, y_ref, var_ref, acc_out_ref, wsum_out_ref,
                     acc_ref, wsum_ref, *, epsilon):
    """Feature-major layout (small D): tiles are (D, tn) / (1, tn)."""
    k = pl.program_id(1)

    @pl.when(k == 0)
    def _():
        acc_ref[...] = jnp.zeros_like(acc_ref)
        wsum_ref[...] = jnp.zeros_like(wsum_ref)

    diff = yp_ref[...] - y_ref[...]                  # (D, tn)  lane-dense
    w = 1.0 / (var_ref[...] + epsilon)               # (1, tn)

    # acc[i, j] += sum_k diff[i, k] * (diff[j, k] * w[k])   (MXU, f32 acc)
    acc_ref[...] += lax.dot_general(
        diff, diff * w,
        dimension_numbers=(((1,), (1,)), ((), ())),
        preferred_element_type=jnp.float32)
    # Vector partial sum of the weights; single reduce at the end.
    wsum_ref[...] += w

    @pl.when(k == pl.num_programs(1) - 1)
    def _():
        acc_out_ref[...] = acc_ref[...]
        wsum_out_ref[...] = jnp.sum(wsum_ref[...], axis=1, keepdims=True)


def _biv_kernel_row(yp_ref, y_ref, var_ref, acc_out_ref, wsum_out_ref,
                    acc_ref, wsum_ref, *, epsilon):
    """Sample-major layout (D >= 128): tiles are (tn, D) / (tn, 1)."""
    k = pl.program_id(1)

    @pl.when(k == 0)
    def _():
        acc_ref[...] = jnp.zeros_like(acc_ref)
        wsum_ref[...] = jnp.zeros_like(wsum_ref)

    diff = yp_ref[...] - y_ref[...]                  # (tn, D)
    w = 1.0 / (var_ref[...] + epsilon)               # (tn, 1)

    # Contract over the row axis directly — no diff.T transpose materialised.
    acc_ref[...] += lax.dot_general(
        diff, diff * w,
        dimension_numbers=(((0,), (0,)), ((), ())),
        preferred_element_type=jnp.float32)
    wsum_ref[...] += w

    @pl.when(k == pl.num_programs(1) - 1)
    def _():
        acc_out_ref[...] = acc_ref[...]
        wsum_out_ref[...] = jnp.sum(wsum_ref[...], axis=0, keepdims=True)


# ----------------------------------------------------------------------------
# Tile sizing / VMEM budgeting
# ----------------------------------------------------------------------------

_VMEM_TILE_BUDGET = 12 * 1024 * 1024   # target bytes for pipelined buffers


def _choose_tn(n_rows, d, lane_dense):
    """Largest row tile (multiple of 512 down to 128) that fits the budget."""
    if lane_dense:
        d_sub = _round_up(d, 8)
        # 2 inputs x 2 buffers x (d_sub, tn) + 2 x (8, tn) var + (8, tn) wsum
        bytes_per_col = 4 * (4 * d_sub + 2 * 8 + 8)
        tn = 2048
        while tn > 128 and tn * bytes_per_col > _VMEM_TILE_BUDGET:
            tn //= 2
        tn = min(tn, _round_up(n_rows, 128))
        return max(_round_up(tn, 128), 128)
    else:
        d_lane = _round_up(d, 128)
        bytes_per_row = 4 * (4 * d_lane + 2 * 128 + 128)
        tn = 2048
        while tn > 128 and tn * bytes_per_row > _VMEM_TILE_BUDGET:
            tn //= 2
        tn = min(tn, _round_up(n_rows, 8))
        return max(_round_up(tn, 8), 8)


def _vmem_estimate(tn, d, lane_dense):
    """Rough VMEM footprint (lane-padded, double-buffered) in bytes."""
    d_sub = _round_up(d, 8)
    d_lane = _round_up(d, 128)
    acc_bytes = d_sub * d_lane * 4
    if lane_dense:
        inputs = 2 * (2 * d_sub * tn + 8 * tn) * 4
        scratch = acc_bytes + 8 * tn * 4
    else:
        inputs = 2 * (2 * tn * d_lane + tn * 128) * 4
        scratch = acc_bytes + tn * 128 * 4
    outputs = 2 * (acc_bytes + 8 * 128 * 4)
    return inputs + scratch + outputs


# ----------------------------------------------------------------------------
# Wrapper
# ----------------------------------------------------------------------------

def biv_loss(y_pred, y, lbl_var, *, epsilon=1e-5, normalize=True,
             tn=None, num_splits=None):
    y_pred = jnp.asarray(y_pred, jnp.float32)
    y = jnp.asarray(y, jnp.float32)
    lbl_var = jnp.asarray(lbl_var, jnp.float32)

    n, d = y_pred.shape
    assert y.shape == (n, d)
    lbl_var = lbl_var.reshape(n, 1)          # per-sample variance

    lane_dense = d < 128                      # feature-major layout for small D

    if tn is None:
        tn = _choose_tn(n, d, lane_dense)
    else:
        tn = _round_up(tn, 128 if lane_dense else 8)

    n_tiles = _cdiv(n, tn)
    if num_splits is None:
        num_splits = 2 if n_tiles >= 2 else 1   # megacore split (helps v7x)
    num_splits = max(1, min(num_splits, n_tiles))
    steps = _cdiv(n_tiles, num_splits)
    n_pad = num_splits * steps * tn

    if n_pad != n:
        pad = n_pad - n
        y_pred = jnp.pad(y_pred, ((0, pad), (0, 0)))
        y = jnp.pad(y, ((0, pad), (0, 0)))
        # inf variance => weight exactly 0 => padded rows contribute nothing.
        lbl_var = jnp.pad(lbl_var, ((0, pad), (0, 0)),
                          constant_values=jnp.inf)

    kernel = functools.partial(
        _biv_kernel_lane if lane_dense else _biv_kernel_row, epsilon=epsilon)

    if lane_dense:
        a = y_pred.T                # (d, n_pad): lane-dense for small d
        b = y.T
        v = lbl_var.T               # (1, n_pad)
        in_specs = [
            pl.BlockSpec((d, tn), lambda c, k: (0, c * steps + k)),
            pl.BlockSpec((d, tn), lambda c, k: (0, c * steps + k)),
            pl.BlockSpec((1, tn), lambda c, k: (0, c * steps + k)),
        ]
        scratch = [pltpu.VMEM((d, d), jnp.float32),   # matmul accumulator
                   pltpu.VMEM((1, tn), jnp.float32)]  # weight-sum partials
    else:
        a, b, v = y_pred, y, lbl_var
        in_specs = [
            pl.BlockSpec((tn, d), lambda c, k: (c * steps + k, 0)),
            pl.BlockSpec((tn, d), lambda c, k: (c * steps + k, 0)),
            pl.BlockSpec((tn, 1), lambda c, k: (c * steps + k, 0)),
        ]
        scratch = [pltpu.VMEM((d, d), jnp.float32),
                   pltpu.VMEM((tn, 1), jnp.float32)]

    # Explicit VMEM budget so double-buffering survives v5e/v6e/v7x defaults.
    # TODO(synk): for very large D, tile the (D, D) accumulator/output over
    # feature blocks instead of holding it whole in VMEM.
    vmem_limit = int(min(max(2 * _vmem_estimate(tn, d, lane_dense),
                             32 * 1024 * 1024),
                         48 * 1024 * 1024))

    partial_acc, partial_wsum = pl.pallas_call(
        kernel,
        out_shape=(
            jax.ShapeDtypeStruct((num_splits, d, d), jnp.float32),
            jax.ShapeDtypeStruct((num_splits, 1, 1), jnp.float32),
        ),
        grid_spec=pltpu.PrefetchScalarGridSpec(
            num_scalar_prefetch=0,
            grid=(num_splits, steps),
            in_specs=in_specs,
            out_specs=(
                pl.BlockSpec((None, d, d), lambda c, k: (c, 0, 0)),
                pl.BlockSpec((None, 1, 1), lambda c, k: (c, 0, 0)),
            ),
            scratch_shapes=scratch,
        ),
        compiler_params=pltpu.CompilerParams(
            dimension_semantics=("parallel", "arbitrary"),
            vmem_limit_bytes=vmem_limit,
        ),
    )(a, b, v)

    l = jnp.sum(partial_acc, axis=0)
    if normalize:
        return l / jnp.sum(partial_wsum)
    return l / jnp.float32(n)                 # original N, not padded


# ----------------------------------------------------------------------------
# Reference + self-test
# ----------------------------------------------------------------------------

def biv_loss_ref(y_pred, y, lbl_var, *, epsilon=1e-5, normalize=True):
    diff = y_pred - y
    w = 1.0 / (lbl_var + epsilon)
    l = diff.T @ (diff * w)
    if normalize:
        return l / jnp.sum(w)
    return l / y.shape[0]


if __name__ == "__main__":
    key = jax.random.PRNGKey(0)
    k1, k2, k3 = jax.random.split(key, 3)

    # Case 1: small feature dim (lane-dense feature-major path), normalized.
    N, D = 256, 8
    y_pred = jax.random.normal(k1, (N, D), dtype=jnp.float32)
    y = jax.random.normal(k2, (N, D), dtype=jnp.float32)
    lbl_var = jax.random.uniform(k3, (N, 1), dtype=jnp.float32,
                                 minval=0.1, maxval=2.0)
    out = jax.block_until_ready(biv_loss(y_pred, y, lbl_var))
    ref = biv_loss_ref(y_pred, y, lbl_var)
    assert jnp.allclose(out, ref, rtol=1e-4, atol=1e-5), (out, ref)

    # Case 2: N not a multiple of the tile, two reduction splits, and the
    #         un-normalized variant (must divide by the ORIGINAL N).
    N2, D2 = 1000, 8
    y_pred2 = jax.random.normal(k1, (N2, D2), dtype=jnp.float32)
    y2 = jax.random.normal(k2, (N2, D2), dtype=jnp.float32)
    lbl_var2 = jax.random.uniform(k3, (N2, 1), dtype=jnp.float32,
                                  minval=0.1, maxval=2.0)
    out2 = jax.block_until_ready(
        biv_loss(y_pred2, y2, lbl_var2, normalize=False, tn=256))
    ref2 = biv_loss_ref(y_pred2, y2, lbl_var2, normalize=False)
    assert jnp.allclose(out2, ref2, rtol=1e-4, atol=1e-5), (out2, ref2)

    # Case 3: larger feature dim (sample-major path).
    N3, D3 = 512, 128
    y_pred3 = jax.random.normal(k1, (N3, D3), dtype=jnp.float32)
    y3 = jax.random.normal(k2, (N3, D3), dtype=jnp.float32)
    lbl_var3 = jax.random.uniform(k3, (N3, 1), dtype=jnp.float32,
                                  minval=0.1, maxval=2.0)
    out3 = jax.block_until_ready(biv_loss(y_pred3, y3, lbl_var3))
    ref3 = biv_loss_ref(y_pred3, y3, lbl_var3)
    assert jnp.allclose(out3, ref3, rtol=1e-4, atol=1e-5), (out3, ref3)

    print("KERNEL_OK")
</pallas_src>

<mosaic_0001>
module attributes {stable_mosaic.version = 11 : i64} {
  func.func @_biv_kernel_lane(%arg0: i32, %arg1: i32, %arg2: memref<8x256xf32, #tpu.memory_space<vmem>>, %arg3: memref<8x256xf32, #tpu.memory_space<vmem>>, %arg4: memref<1x256xf32, #tpu.memory_space<vmem>>, %arg5: memref<1x8x8xf32, #tpu.memory_space<vmem>>, %arg6: memref<1x1x1xf32, #tpu.memory_space<vmem>>, %arg7: memref<8x8xf32, #tpu.memory_space<vmem>>, %arg8: memref<1x256xf32, #tpu.memory_space<vmem>>) attributes {dimension_semantics = [#tpu.dimension_semantics<parallel>, #tpu.dimension_semantics<arbitrary>], iteration_bounds = array<i64: 1, 1>, scalar_prefetch = 0 : i64, scratch_operands = 2 : i64, tpu.core_type = #tpu.core_type<tc>, window_params = [{transform_indices = @transform_0, window_bounds = array<i64: 8, 256>}, {transform_indices = @transform_1, window_bounds = array<i64: 8, 256>}, {transform_indices = @transform_2, window_bounds = array<i64: 1, 256>}, {transform_indices = @transform_3, window_bounds = array<i64: 1, 8, 8>}, {transform_indices = @transform_4, window_bounds = array<i64: 1, 1, 1>}]} {
    %c0_i32 = arith.constant 0 : i32
    %0 = arith.cmpi eq, %arg1, %c0_i32 : i32
    %1 = arith.extui %0 : i1 to i32
    %c0_i32_0 = arith.constant 0 : i32
    %2 = arith.cmpi ne, %1, %c0_i32_0 : i32
    scf.if %2 {
      %cst_18 = arith.constant 0.000000e+00 : f32
      %23 = vector.broadcast %cst_18 : f32 to vector<8x8xf32>
      %c0_19 = arith.constant 0 : index
      %c0_20 = arith.constant 0 : index
      %24 = vector.load %arg7[%c0_19, %c0_20] : memref<8x8xf32, #tpu.memory_space<vmem>>, vector<8x8xf32>
      tpu.vector_store %arg7[%c0_19, %c0_20], %23 {strides = array<i32>} : memref<8x8xf32, #tpu.memory_space<vmem>>, vector<8x8xf32>,
      %cst_21 = arith.constant 0.000000e+00 : f32
      %25 = vector.broadcast %cst_21 : f32 to vector<1x256xf32>
      %c0_22 = arith.constant 0 : index
      %c0_23 = arith.constant 0 : index
      %26 = vector.load %arg8[%c0_22, %c0_23] : memref<1x256xf32, #tpu.memory_space<vmem>>, vector<1x256xf32>
      tpu.vector_store %arg8[%c0_22, %c0_23], %25 {strides = array<i32>} : memref<1x256xf32, #tpu.memory_space<vmem>>, vector<1x256xf32>,
    } else {
    }
    %c0 = arith.constant 0 : index
    %c0_1 = arith.constant 0 : index
    %3 = vector.load %arg2[%c0, %c0_1] : memref<8x256xf32, #tpu.memory_space<vmem>>, vector<8x256xf32>
    %c0_2 = arith.constant 0 : index
    %c0_3 = arith.constant 0 : index
    %4 = vector.load %arg3[%c0_2, %c0_3] : memref<8x256xf32, #tpu.memory_space<vmem>>, vector<8x256xf32>
    %5 = arith.subf %3, %4 : vector<8x256xf32>
    %c0_4 = arith.constant 0 : index
    %c0_5 = arith.constant 0 : index
    %6 = vector.load %arg4[%c0_4, %c0_5] : memref<1x256xf32, #tpu.memory_space<vmem>>, vector<1x256xf32>
    %cst = arith.constant 9.99999974E-6 : f32
    %7 = vector.broadcast %cst : f32 to vector<1x256xf32>
    %8 = arith.addf %6, %7 : vector<1x256xf32>
    %cst_6 = arith.constant 1.000000e+00 : f32
    %9 = vector.broadcast %cst_6 : f32 to vector<1x256xf32>
    %10 = arith.divf %9, %8 : vector<1x256xf32>
    %c0_7 = arith.constant 0 : index
    %c0_8 = arith.constant 0 : index
    %11 = vector.load %arg7[%c0_7, %c0_8] : memref<8x8xf32, #tpu.memory_space<vmem>>, vector<8x8xf32>
    %12 = vector.broadcast %10 : vector<1x256xf32> to vector<8x256xf32>
    %13 = arith.mulf %5, %12 : vector<8x256xf32>
    %cst_9 = arith.constant dense<0.000000e+00> : vector<8x8xf32>
    %14 = tpu.matmul %5, %13, %cst_9 {dimension_numbers = #tpu.dot_dimension_numbers<[1], [1], [0], [0], [0, 0, 1, 0], [], []>} : vector<8x256xf32>, vector<8x256xf32>, vector<8x8xf32> -> vector<8x8xf32>
    %15 = arith.addf %11, %14 : vector<8x8xf32>
    %c0_10 = arith.constant 0 : index
    %c0_11 = arith.constant 0 : index
    %16 = vector.load %arg7[%c0_10, %c0_11] : memref<8x8xf32, #tpu.memory_space<vmem>>, vector<8x8xf32>
    tpu.vector_store %arg7[%c0_10, %c0_11], %15 {strides = array<i32>} : memref<8x8xf32, #tpu.memory_space<vmem>>, vector<8x8xf32>,
    %c0_12 = arith.constant 0 : index
    %c0_13 = arith.constant 0 : index
    %17 = vector.load %arg8[%c0_12, %c0_13] : memref<1x256xf32, #tpu.memory_space<vmem>>, vector<1x256xf32>
    %18 = arith.addf %17, %10 : vector<1x256xf32>
    %c0_14 = arith.constant 0 : index
    %c0_15 = arith.constant 0 : index
    %19 = vector.load %arg8[%c0_14, %c0_15] : memref<1x256xf32, #tpu.memory_space<vmem>>, vector<1x256xf32>
    tpu.vector_store %arg8[%c0_14, %c0_15], %18 {strides = array<i32>} : memref<1x256xf32, #tpu.memory_space<vmem>>, vector<1x256xf32>,
    %c0_i32_16 = arith.constant 0 : i32
    %20 = arith.cmpi eq, %arg1, %c0_i32_16 : i32
    %21 = arith.extui %20 : i1 to i32
    %c0_i32_17 = arith.constant 0 : i32
    %22 = arith.cmpi ne, %21, %c0_i32_17 : i32
    scf.if %22 {
      %c0_18 = arith.constant 0 : index
      %c0_19 = arith.constant 0 : index
      %23 = vector.load %arg7[%c0_18, %c0_19] : memref<8x8xf32, #tpu.memory_space<vmem>>, vector<8x8xf32>
      %c0_20 = arith.constant 0 : index
      %c0_21 = arith.constant 0 : index
      %c0_22 = arith.constant 0 : index
      %24 = vector.load %arg5[%c0_20, %c0_21, %c0_22] : memref<1x8x8xf32, #tpu.memory_space<vmem>>, vector<1x8x8xf32>
      %25 = vector.shape_cast %24 : vector<1x8x8xf32> to vector<8x8xf32>
      %26 = vector.shape_cast %23 : vector<8x8xf32> to vector<1x8x8xf32>
      tpu.vector_store %arg5[%c0_20, %c0_21, %c0_22], %26 {strides = array<i32>} : memref<1x8x8xf32, #tpu.memory_space<vmem>>, vector<1x8x8xf32>,
      %c0_23 = arith.constant 0 : index
      %c0_24 = arith.constant 0 : index
      %27 = vector.load %arg8[%c0_23, %c0_24] : memref<1x256xf32, #tpu.memory_space<vmem>>, vector<1x256xf32>
      %cst_25 = arith.constant dense<0.000000e+00> : vector<1xf32>
      %28 = vector.multi_reduction <add>, %27, %cst_25 [1] : vector<1x256xf32> to vector<1xf32>
      %29 = vector.shape_cast %28 : vector<1xf32> to vector<1x1xf32>
      %c0_26 = arith.constant 0 : index
      %c0_27 = arith.constant 0 : index
      %c0_28 = arith.constant 0 : index
      %30 = vector.load %arg6[%c0_26, %c0_27, %c0_28] : memref<1x1x1xf32, #tpu.memory_space<vmem>>, vector<1x1x1xf32>
      %31 = vector.shape_cast %30 : vector<1x1x1xf32> to vector<1x1xf32>
      %32 = vector.shape_cast %29 : vector<1x1xf32> to vector<1x1x1xf32>
      tpu.vector_store %arg6[%c0_26, %c0_27, %c0_28], %32 {strides = array<i32>} : memref<1x1x1xf32, #tpu.memory_space<vmem>>, vector<1x1x1xf32>,
    } else {
    }
    return
  }
  func.func @transform_0(%arg0: i32, %arg1: i32) -> (i32, i32) {
    %c1_i32 = arith.constant 1 : i32
    %0 = arith.muli %arg0, %c1_i32 : i32
    %1 = arith.addi %0, %arg1 : i32
    %c0_i32 = arith.constant 0 : i32
    %c0_i32_0 = arith.constant 0 : i32
    return %c0_i32, %1 : i32, i32
  }
  func.func @transform_1(%arg0: i32, %arg1: i32) -> (i32, i32) {
    %c1_i32 = arith.constant 1 : i32
    %0 = arith.muli %arg0, %c1_i32 : i32
    %1 = arith.addi %0, %arg1 : i32
    %c0_i32 = arith.constant 0 : i32
    %c0_i32_0 = arith.constant 0 : i32
    return %c0_i32, %1 : i32, i32
  }
  func.func @transform_2(%arg0: i32, %arg1: i32) -> (i32, i32) {
    %c1_i32 = arith.constant 1 : i32
    %0 = arith.muli %arg0, %c1_i32 : i32
    %1 = arith.addi %0, %arg1 : i32
    %c0_i32 = arith.constant 0 : i32
    %c0_i32_0 = arith.constant 0 : i32
    return %c0_i32, %1 : i32, i32
  }
  func.func @transform_3(%arg0: i32, %arg1: i32) -> (i32, i32, i32) {
    %c0_i32 = arith.constant 0 : i32
    %c0_i32_0 = arith.constant 0 : i32
    %c0_i32_1 = arith.constant 0 : i32
    return %arg0, %c0_i32, %c0_i32_0 : i32, i32, i32
  }
  func.func @transform_4(%arg0: i32, %arg1: i32) -> (i32, i32, i32) {
    %c0_i32 = arith.constant 0 : i32
    %c0_i32_0 = arith.constant 0 : i32
    %c0_i32_1 = arith.constant 0 : i32
    return %arg0, %c0_i32, %c0_i32_0 : i32, i32, i32
  }
}

</mosaic_0001>

<bundles_post_ra>
// kernel: tpu_custom_call.1
= control target key start
LH: loop header
LB: loop body
LE: loop exit
PB: predicated region body
PF: predicated region fallthrough
CT: control target
= control target key end

     0   :  { %10 = vsyncpa [#allocation5], 0  ;;  %s441_s0 = inlined_call_operand.hbm [shape: f32[8,256], index: 0, kind: input, shape index: {}]   ;;  %s442_s1 = inlined_call_operand.hbm [shape: f32[8,256], index: 1, kind: input, shape index: {}]   ;;  %s443_s2 = inlined_call_operand.vmem [shape: f32[1,256], index: 2, kind: input, shape index: {}]   ;;  %s444_s3 = inlined_call_operand.hbm [shape: f32[1,8,8], index: 3, kind: output, shape index: {0}]   ;;  %s445_s4 = inlined_call_operand.hbm [shape: f32[1,1,1], index: 4, kind: output, shape index: {1}]  }
   0x1   :  { %11 = vsyncpa [#allocation8], 0 }
   0x2   :  { %12 = vsyncpa [#allocation6], 0 }
   0x3   :  { %13 = vsyncpa [#allocation11], 0  ;;  %s349_s15 = smov [#allocation4]   ;;  %s350_s17 = smov [#allocation7]  }
   0x4   :  { %s24_s16 = sshll.u32 %s349_s15, 4  ;;  %s38_s18 = sshll.u32 %s350_s17, 4  ;;  %s25_s16 = int_to_ptr.vmem [resolvable:$true] %s24_s16  ;;  %s39_s18 = int_to_ptr.vmem [resolvable:$true] %s38_s18 }
   0x5   :  { %s253_s21 = scalar_lea.hbm %s441_s0, 256 }
   0x6   :  { %p254_p0 = scmp.ne.s32.totalorder %s441_s0, %s253_s21  ;;  %p257_p1 = scmp.lt.u32.totalorder %s253_s21, %s441_s0 }
   0x8   :  { %p259_p2 = pnand %p257_p1, %p254_p0 }
   0xa   :  { %262 = shalt.err (!%p259_p2)
}
   0xb   :  { %s263_s26 = scalar_lea.vmem %s25_s16, 256  ;;  %p268_p4 = scmp.lt.s32.totalorder %s25_s16, %s25_s16 }
   0xc   :  { %p264_p3 = scmp.ne.s32.totalorder %s25_s16, %s263_s26  ;;  %p269_p5 = scmp.lt.s32.totalorder %s263_s26, %s263_s26 }
   0xe   :  { %p270_p6 = por %p269_p5, %p268_p4 }
  0x10   :  { %p271_p7 = pnand %p270_p6, %p264_p3 }
  0x12   :  { %274 = shalt.err (!%p271_p7)
}
  0x13   :  { %27 = dma.hbm_to_vmem [thread:$0]  %s441_s0, 256, %s25_s16, [#allocation5]  }
  0x14   :  { %s275_s5 = scalar_lea.hbm %s442_s1, 256 }
  0x15   :  { %p276_p8 = scmp.ne.s32.totalorder %s442_s1, %s275_s5  ;;  %p279_p9 = scmp.lt.u32.totalorder %s275_s5, %s442_s1 }
  0x17   :  { %p281_p10 = pnand %p279_p9, %p276_p8 }
  0x19   :  { %284 = shalt.err (!%p281_p10)
}
  0x1a   :  { %s285_s10 = scalar_lea.vmem %s39_s18, 256  ;;  %p290_p12 = scmp.lt.s32.totalorder %s39_s18, %s39_s18 }
  0x1b   :  { %p286_p11 = scmp.ne.s32.totalorder %s39_s18, %s285_s10  ;;  %p291_p13 = scmp.lt.s32.totalorder %s285_s10, %s285_s10 }
  0x1d   :  { %p292_p0 = por %p291_p13, %p290_p12 }
  0x1f   :  { %p293_p1 = pnand %p292_p0, %p286_p11 }
  0x21   :  { %296 = shalt.err (!%p293_p1)
}
  0x22   :  { %41 = dma.hbm_to_vmem [thread:$0]  %s442_s1, 256, %s39_s18, [#allocation8]  }
  0x23   :  { %341 = dma.done.wait [#allocation5], 256  }
  0x24   :  { %342 = vsyncadd [#allocation5], 4294967040 }
  0x25   :  { %343 = dma.done.wait [#allocation8], 256  }
  0x26   :  { %344 = vsyncadd [#allocation8], 4294967040  ;;  %v79_v0 = vlaneseq  ;;  %vm77_vm0 = vcmask 64512   ;;  %v351_v1 = vmov 0.0   ;;  %v85_v3 = vld [vmem:[#allocation4 + $0x8] sm:$0xff]  ;;  %v87_v4 = vld [vmem:[#allocation7 + $0x8] sm:$0xff] }
  0x27   :  { %78 = vst.msk [vmem:[#allocation2] sm:$0xff] %vm77_vm0, %v351_v1  ;;  %v90_v5 = vld [vmem:[%s443_s2] sm:$0x3]  ;;  %v89_v6 = vsub.f32 %v85_v3, %v87_v4  ;;  %v84_v9 = vld [vmem:[#allocation4] sm:$0xff]  ;;  %vm205_vm2 = vcmask 1040384   ;;  %s352_s2 = smov [#allocation10]  }
  0x28   :  { %vm404_vm1 = vcmp.lt.s32.totalorder %v79_v0, 256  ;;  %v91_v7 = vadd.f32 1e-05, %v90_v5  ;;  %v97_v8 = vshrl.u32 %v79_v0, 7  ;;  %v86_v10 = vld [vmem:[#allocation7] sm:$0xff]  ;;  %s229_s13 = sshll.u32 %s352_s2, 4  ;;  %s230_s13 = int_to_ptr.vmem [resolvable:$true] %s229_s13 }
  0x29   :  { %83 = vst.msk [vmem:[#allocation3] sm:$0x3] %vm404_vm1, %v351_v1  ;;  %172 = vmatprep.mubr.f32.mxu0 %v89_v6  ;;  %v88_v14 = vsub.f32 %v84_v9, %v86_v10  ;;  %vm211_vm3 = vcmask 0   ;;  %s297_s14 = scalar_lea.vmem %s230_s13, 16  ;;  %s301_s15 = scalar_lea.vmem %s230_s13, 32 }
  0x2a   :  { %251 = vrcp.f32 %v91_v7  ;;  %v102_v11 = vsub.s32 1, %v97_v8  ;;  %v98_v12 = vsub.s32 0, %v97_v8  ;;  %p298_p2 = scmp.ne.s32.totalorder %s230_s13, %s297_s14  ;;  %p302_p3 = scmp.lt.s32.totalorder %s230_s13, %s230_s13 }
  0x2b   :  { %p303_p4 = scmp.lt.s32.totalorder %s301_s15, %s297_s14 }
  0x2d   :  { %p304_p5 = por %p303_p4, %p302_p3 }
  0x2f   :  { %p305_p6 = pnand %p304_p5, %p298_p2 }
  0x30   :  { %v181_v13 = vld [vmem:[#allocation3] sm:$0x3] }
  0x34   :  { %v252_v15 = vpop.eup %251 }
  0x35   :  { %v103_v16 = vrot.slane %v252_v15, %v102_v11  ;;  %v182_v17 = vadd.f32 %v252_v15, %v181_v13  ;;  %v99_v18 = vrot.slane %v252_v15, %v98_v12 }
  0x37   :  { %v107_v19 = vmul.f32 %v103_v16, %v89_v6  ;;  %187 = vst.msk [vmem:[#allocation3] sm:$0x3] %vm404_vm1, %v182_v17  ;;  %v106_v20 = vmul.f32 %v99_v18, %v88_v14 }
  0x39   :  { %108 = vmatprep.subr.mxu0 %v107_v19 }
  0x3a   :  { %109 = vmatpush1.xpose.msra.mxu0 %v106_v20 }
  0x3d   :  { %173 = vmatmul.mubr.f32.vlgmr.msra.gmra.mrb[0].mxu0 %v88_v14 }
  0x3e   :  { %v193_v21 = vld [vmem:[#allocation3] sm:$0x3] }
  0x3f   :  { %v198_v22 = vrot.slane %v193_v21, %v98_v12  ;;  %v202_v23 = vrot.slane %v193_v21, %v102_v11 }
  0x41   :  { %v206_v24 = vsel %vm205_vm2, %v198_v22, 0.0  ;;  %v207_v25 = vsel %vm205_vm2, %v202_v23, 0.0 }
  0x42   :  { %v208_v26 = vadd.f32 %v207_v25, %v206_v24 }
  0x44   :  { %209 = vadd.xlane.f32.xlu0 %v208_v26 }
  0xd1   :  { %v210_v27 = vpop.xlane.xlu0 %209 }
  0xd2   :  { %212 = vst.msk [vmem:[#allocation10] sm:$0x1] %vm211_vm3, %v210_v27 }
  0xd3   :  { %308 = shalt.err (!%p305_p6)
}
  0xd4   :  { %s309_s18 = scalar_lea.hbm %s445_s4, 16 }
  0xd5   :  { %p310_p7 = scmp.ne.s32.totalorder %s445_s4, %s309_s18  ;;  %p313_p8 = scmp.lt.u32.totalorder %s309_s18, %s445_s4 }
  0xd7   :  { %p315_p9 = pnand %p313_p8, %p310_p7 }
  0xd9   :  { %318 = shalt.err (!%p315_p9)
}
  0xda   :  { %232 = dma.vmem_to_hbm [thread:$0]  %s230_s13, 16, %s445_s4, [#allocation11]   ;;  %v94_v28 = vld [vmem:[#allocation2] sm:$0xff] }
  0xdb   :  { %s353_s25 = smov [#allocation9]  }
  0xdc   :  { %s219_s26 = sshll.u32 %s353_s25, 4  ;;  %s220_s26 = int_to_ptr.vmem [resolvable:$true] %s219_s26 }
  0xdd   :  { %s319_s27 = scalar_lea.vmem %s220_s26, 128  ;;  %p324_p11 = scmp.lt.s32.totalorder %s220_s26, %s220_s26 }
  0xde   :  { %p320_p10 = scmp.ne.s32.totalorder %s220_s26, %s319_s27  ;;  %p325_p12 = scmp.lt.s32.totalorder %s319_s27, %s319_s27 }
  0xe0   :  { %p326_p13 = por %p325_p12, %p324_p11 }
  0xe2   :  { %p327_p0 = pnand %p326_p13, %p320_p10 }
 0x110   :  { %v174_v29 = vpop.f32.mrb[0].mxu0 }
 0x111   :  { %v178_v30 = vadd.f32 %v174_v29, %v94_v28  ;;  %v176_v31 = vpop.f32.mrb[1].mxu0 }
 0x113   :  { %180 = vst.msk [vmem:[#allocation2] sm:$0xff] %vm77_vm0, %v178_v30 }
 0x11a   :  { %v191_v32 = vld [vmem:[#allocation2] sm:$0xff] }
 0x11b   :  { %192 = vst.msk [vmem:[#allocation9] sm:$0xff] %vm77_vm0, %v191_v32 }
 0x11c   :  { %330 = shalt.err (!%p327_p0)
}
 0x11d   :  { %s331_s29 = scalar_lea.hbm %s444_s3, 128 }
 0x11e   :  { %p332_p1 = scmp.ne.s32.totalorder %s444_s3, %s331_s29  ;;  %p335_p2 = scmp.lt.u32.totalorder %s331_s29, %s444_s3 }
 0x120   :  { %p337_p3 = pnand %p335_p2, %p332_p1 }
 0x122   :  { %340 = shalt.err (!%p337_p3)
}
 0x123   :  { %222 = dma.vmem_to_hbm [thread:$0]  %s220_s26, 128, %s444_s3, [#allocation6]  }
 0x124   :  { %345 = dma.done.wait [#allocation6], 128  }
 0x125   :  { %346 = vsyncadd [#allocation6], 4294967168 }
 0x126   :  { %347 = dma.done.wait [#allocation11], 16  }
 0x127   :  { %348 = vsyncadd [#allocation11], 4294967280 }
 0x128   :  { %239 = vsyncpa [#allocation5], 1 }
 0x129   :  { %240 = vsyncpa [#allocation8], 1 }
 0x12a   :  { %241 = vsyncpa [#allocation6], 1 }
 0x12b   :  { %242 = vsyncpa [#allocation11], 1 }

</bundles_post_ra>
